<compile_context>
chip_gen: v7x
topology: tpu7x:2x2x1
jax: 0.10.0
libtpu: 0.0.40
codegen_flags: <defaults>
</compile_context>

<pallas_src>
import functools
import math

import jax
import jax.numpy as jnp
from jax.experimental import pallas as pl
from jax.experimental.pallas import tpu as pltpu


def _round_up(x, m):
    return (x + m - 1) // m * m


def _linear_kernel(x_ref, w_ref, b_ref, o_ref):
    # MXU matmul with f32 accumulation + f32 bias add on the VPU, cast on store.
    acc = jnp.dot(x_ref[...], w_ref[...], preferred_element_type=jnp.float32)
    o_ref[...] = (acc + b_ref[...]).astype(o_ref.dtype)


def prepare_params(weight, bias):
    """One-time (not per-call) parameter prep.

    weight: [C_out, C_in] (PyTorch Linear layout), bias: [C_out].
    Returns (w_t_padded [C_in, C_out_p], bias_padded [1, C_out_p], c_out) where
    C_out_p is C_out rounded up to a multiple of 128 (lane-dense output).
    """
    c_out, c_in = weight.shape
    c_out_p = max(_round_up(c_out, 128), 128)
    w_t = jnp.zeros((c_in, c_out_p), weight.dtype).at[:, :c_out].set(weight.T)
    b2d = jnp.zeros((1, c_out_p), bias.dtype).at[0, :c_out].set(bias)
    return w_t, b2d, int(c_out)


@functools.partial(jax.jit, static_argnames=("c_out", "block_m"))
def gat_like_mlp_forward(x, w_t, b2d, *, c_out, block_m=1024):
    """x: [N, C_in], w_t: [C_in, C_out_p] (pre-transposed+padded), b2d: [1, C_out_p]."""
    n, c_in = x.shape
    c_in_w, c_out_p = w_t.shape
    assert c_in == c_in_w

    x_bytes = jnp.dtype(x.dtype).itemsize
    w_bytes = jnp.dtype(w_t.dtype).itemsize

    def working_set(tm):
        # double-buffered x in + out writeback, single-buffered resident W/bias
        return (2 * tm * c_in * x_bytes
                + 2 * tm * c_out_p * x_bytes
                + c_in * c_out_p * w_bytes
                + c_out_p * 4)

    # Row tile: as large as fits a conservative VMEM budget (v7x-safe).
    budget = 48 * 1024 * 1024
    tm = _round_up(min(block_m, _round_up(n, 8)), 8)
    while tm > 8 and working_set(tm) > budget:
        tm = max(8, _round_up(tm // 2, 8))

    n_pad = _round_up(n, tm)
    if n_pad != n:
        x = jnp.pad(x, ((0, n_pad - n), (0, 0)))

    grid = (n_pad // tm,)

    cost = pl.CostEstimate(
        flops=2 * n_pad * c_in * c_out_p,
        transcendentals=0,
        bytes_accessed=(n_pad * c_in * x_bytes
                        + c_in * c_out_p * w_bytes
                        + c_out_p * 4
                        + n_pad * c_out_p * x_bytes),
    )

    vmem_limit = int(max(min(working_set(tm) + (8 << 20), 64 << 20), 32 << 20))

    out_padded = pl.pallas_call(
        _linear_kernel,
        out_shape=jax.ShapeDtypeStruct((n_pad, c_out_p), x.dtype),
        grid_spec=pltpu.PrefetchScalarGridSpec(
            num_scalar_prefetch=0,
            grid=grid,
            in_specs=[
                pl.BlockSpec((tm, c_in), lambda i: (i, 0)),        # rows tile
                pl.BlockSpec((c_in, c_out_p), lambda i: (0, 0)),   # VMEM-resident W
                pl.BlockSpec((1, c_out_p), lambda i: (0, 0)),      # VMEM-resident bias
            ],
            out_specs=pl.BlockSpec((tm, c_out_p), lambda i: (i, 0)),
        ),
        compiler_params=pltpu.CompilerParams(
            dimension_semantics=("parallel",),
            vmem_limit_bytes=vmem_limit,
        ),
        cost_estimate=cost,
    )(x, w_t, b2d)

    return out_padded[:n, :c_out]


def init_params(key, in_channels, out_channels, heads):
    """Deterministic init mirroring torch.nn.Linear.reset_parameters()."""
    total_out = heads * out_channels
    k_w, k_b = jax.random.split(key)
    # kaiming_uniform_(a=sqrt(5)) on [out, in] -> bound = 1/sqrt(fan_in)
    bound = 1.0 / math.sqrt(in_channels)
    weight = jax.random.uniform(
        k_w, (total_out, in_channels), jnp.float32, -bound, bound)
    bias = jax.random.uniform(
        k_b, (total_out,), jnp.float32, -bound, bound)
    return weight, bias


if __name__ == "__main__":
    key = jax.random.PRNGKey(0)
    k_x, k_p = jax.random.split(key)

    # Small shapes consistent with the module: N nodes, in_channels, heads*out_channels.
    N, IN_CH, OUT_CH, HEADS = 64, 32, 16, 2

    x = jax.random.normal(k_x, (N, IN_CH), jnp.float32)
    weight, bias = init_params(k_p, IN_CH, OUT_CH, HEADS)

    # One-time parameter preparation (transpose + lane padding) — outside the per-call path.
    w_t_p, b_p, c_out = prepare_params(weight, bias)

    out = gat_like_mlp_forward(x, w_t_p, b_p, c_out=c_out)
    out = jax.block_until_ready(out)

    # Cross-check against plain-JAX reference of the same math.
    ref = x @ weight.T + bias
    assert out.shape == (N, HEADS * OUT_CH)
    assert jnp.allclose(out, ref, atol=1e-5, rtol=1e-5)

    print("KERNEL_OK")
</pallas_src>

<mosaic_0001>
module attributes {stable_mosaic.version = 11 : i64} {
  func.func @_linear_kernel(%arg0: i32, %arg1: memref<64x32xf32, #tpu.memory_space<vmem>>, %arg2: memref<32x128xf32, #tpu.memory_space<vmem>>, %arg3: memref<1x128xf32, #tpu.memory_space<vmem>>, %arg4: memref<64x128xf32, #tpu.memory_space<vmem>>) attributes {dimension_semantics = [#tpu.dimension_semantics<parallel>], iteration_bounds = array<i64: 1>, scalar_prefetch = 0 : i64, scratch_operands = 0 : i64, tpu.core_type = #tpu.core_type<tc>, window_params = [{transform_indices = @transform_0, window_bounds = array<i64: 64, 32>}, {pipeline_mode = #tpu.pipeline_mode<synchronous>, transform_indices = @transform_1, window_bounds = array<i64: 32, 128>}, {pipeline_mode = #tpu.pipeline_mode<synchronous>, transform_indices = @transform_2, window_bounds = array<i64: 1, 128>}, {transform_indices = @transform_3, window_bounds = array<i64: 64, 128>}]} {
    %c0 = arith.constant 0 : index
    %c0_0 = arith.constant 0 : index
    %0 = vector.load %arg1[%c0, %c0_0] : memref<64x32xf32, #tpu.memory_space<vmem>>, vector<64x32xf32>
    %c0_1 = arith.constant 0 : index
    %c0_2 = arith.constant 0 : index
    %1 = vector.load %arg2[%c0_1, %c0_2] : memref<32x128xf32, #tpu.memory_space<vmem>>, vector<32x128xf32>
    %cst = arith.constant dense<0.000000e+00> : vector<64x128xf32>
    %2 = tpu.matmul %0, %1, %cst {dimension_numbers = #tpu.dot_dimension_numbers<[1], [0], [0], [1], [0, 0, 1, 1], [], []>} : vector<64x32xf32>, vector<32x128xf32>, vector<64x128xf32> -> vector<64x128xf32>
    %c0_3 = arith.constant 0 : index
    %c0_4 = arith.constant 0 : index
    %3 = vector.load %arg3[%c0_3, %c0_4] : memref<1x128xf32, #tpu.memory_space<vmem>>, vector<1x128xf32>
    %4 = vector.broadcast %3 : vector<1x128xf32> to vector<64x128xf32>
    %5 = arith.addf %2, %4 : vector<64x128xf32>
    %c0_5 = arith.constant 0 : index
    %c0_6 = arith.constant 0 : index
    %6 = vector.load %arg4[%c0_5, %c0_6] : memref<64x128xf32, #tpu.memory_space<vmem>>, vector<64x128xf32>
    tpu.vector_store %arg4[%c0_5, %c0_6], %5 {strides = array<i32>} : memref<64x128xf32, #tpu.memory_space<vmem>>, vector<64x128xf32>,
    return
  }
  func.func @transform_0(%arg0: i32) -> (i32, i32) {
    %c0_i32 = arith.constant 0 : i32
    %c0_i32_0 = arith.constant 0 : i32
    return %arg0, %c0_i32 : i32, i32
  }
  func.func @transform_1(%arg0: i32) -> (i32, i32) {
    %c0_i32 = arith.constant 0 : i32
    %c0_i32_0 = arith.constant 0 : i32
    %c0_i32_1 = arith.constant 0 : i32
    return %c0_i32, %c0_i32_0 : i32, i32
  }
  func.func @transform_2(%arg0: i32) -> (i32, i32) {
    %c0_i32 = arith.constant 0 : i32
    %c0_i32_0 = arith.constant 0 : i32
    %c0_i32_1 = arith.constant 0 : i32
    return %c0_i32, %c0_i32_0 : i32, i32
  }
  func.func @transform_3(%arg0: i32) -> (i32, i32) {
    %c0_i32 = arith.constant 0 : i32
    %c0_i32_0 = arith.constant 0 : i32
    return %arg0, %c0_i32 : i32, i32
  }
}

</mosaic_0001>

<bundles_post_ra>
// kernel: gat_like_mlp_forward.1
= control target key start
LH: loop header
LB: loop body
LE: loop exit
PB: predicated region body
PF: predicated region fallthrough
CT: control target
= control target key end

     0   :  { %vm33_vm0 = vcmask 261120   ;;  %s319_s1 = inlined_call_operand.vmem [shape: f32[32,128], index: 1, kind: input, shape index: {}]   ;;  %s320_s0 = inlined_call_operand.vmem [shape: f32[64,32], index: 0, kind: input, shape index: {}]   ;;  %s321_s2 = inlined_call_operand.vmem [shape: f32[1,128], index: 2, kind: input, shape index: {}]   ;;  %s322_s3 = inlined_call_operand.vmem [shape: f32[64,128], index: 3, kind: output, shape index: {}]  }
   0x1   :  { %v22_v0 = vld [vmem:[%s319_s1] sm:$0xff]  ;;  %v23_v1 = vld [vmem:[%s319_s1 + $0x8] sm:$0xff]  ;;  %v24_v2 = vld [vmem:[%s319_s1 + $0x10] sm:$0xff] }
   0x2   :  { %v216_v3 = vpack.c.bf16 %v23_v1, %v22_v0  ;;  %v25_v4 = vld [vmem:[%s319_s1 + $0x18] sm:$0xff]  ;;  %v14_v5 = vld [vmem:[%s320_s0] sm:$0xff]  ;;  %v15_v8 = vld [vmem:[%s320_s0 + $0x8] sm:$0xff] }
   0x3   :  { %v18_v6 = vld [vmem:[%s320_s0 + $0x20] sm:$0xff]  ;;  %v220_v7 = vpack.c.bf16 %v25_v4, %v24_v2  ;;  %204 = vmatprep.mubr.msk.f32.mxu0 %vm33_vm0, %v14_v5  ;;  %v19_v9 = vld [vmem:[%s320_s0 + $0x28] sm:$0xff]  ;;  %v16_v10 = vld [vmem:[%s320_s0 + $0x10] sm:$0xff] }
   0x4   :  { %210 = vmatprep.mubr.msk.f32.mxu1 %vm33_vm0, %v18_v6  ;;  %217 = vmatprep.subr.bf16.mxu0 %v216_v3  ;;  %v20_v11 = vld [vmem:[%s320_s0 + $0x30] sm:$0xff]  ;;  %v17_v12 = vld [vmem:[%s320_s0 + $0x18] sm:$0xff]  ;;  %v175_v14 = vld [vmem:[%s321_s2] ss:$0 sm:$0xff] }
   0x5   :  { %224 = vmatprep.subr.bf16.mxu1 %v216_v3  ;;  %219 = vmatpush3.bf16.msra.mxu0 %v216_v3  ;;  %v21_v13 = vld [vmem:[%s320_s0 + $0x38] sm:$0xff] }
   0x6   :  { %226 = vmatpush3.bf16.msra.mxu1 %v216_v3  ;;  %221 = vmatprep.subr.bf16.mxu0 %v220_v7 }
   0x7   :  { %225 = vmatprep.subr.bf16.mxu1 %v220_v7 }
   0x9   :  { %223 = vmatpush3.bf16.msra.mxu0 %v220_v7 }
   0xa   :  { %227 = vmatpush3.bf16.msra.mxu1 %v220_v7 }
   0xc   :  { %205 = vmatmul.mubr.msk.f32.vlgmr.msra.gmra.mrb[0].mxu0 %vm33_vm0, %v15_v8 }
   0xd   :  { %211 = vmatmul.mubr.msk.f32.vlgmr.msra.gmra.mrb[0].mxu1 %vm33_vm0, %v19_v9  ;;  %207 = vmatprep.mubr.msk.f32.mxu0 %vm33_vm0, %v16_v10 }
   0xe   :  { %213 = vmatprep.mubr.msk.f32.mxu1 %vm33_vm0, %v20_v11 }
  0x10   :  { %208 = vmatmul.mubr.msk.f32.gmra.mrb[2].mxu0 %vm33_vm0, %v17_v12 }
  0x11   :  { %214 = vmatmul.mubr.msk.f32.gmra.mrb[2].mxu1 %vm33_vm0, %v21_v13 }
  0xdf   :  { %v206_v15 = vpop.f32.mrb[0].mxu0 }
  0xe0   :  { %v212_v16 = vpop.f32.mrb[0].mxu1  ;;  %v130_v17 = vadd.f32 %v206_v15, %v175_v14  ;;  %v124_v19 = vpop.f32.mrb[1].mxu0 }
  0xe1   :  { %v150_v18 = vadd.f32 %v212_v16, %v175_v14  ;;  %v144_v20 = vpop.f32.mrb[1].mxu1  ;;  %v125_v21 = vadd.f32 %v175_v14, %v124_v19 }
  0xe2   :  { %v145_v22 = vadd.f32 %v175_v14, %v144_v20  ;;  %164 = vst [vmem:[%s322_s3 + $0x8] sm:$0xff] %v130_v17 }
  0xe3   :  { %168 = vst [vmem:[%s322_s3 + $0x28] sm:$0xff] %v150_v18  ;;  %163 = vst [vmem:[%s322_s3] sm:$0xff] %v125_v21  ;;  %v209_v23 = vpop.f32.mrb[2].mxu0 }
  0xe4   :  { %167 = vst [vmem:[%s322_s3 + $0x20] sm:$0xff] %v145_v22  ;;  %v215_v24 = vpop.f32.mrb[2].mxu1  ;;  %v140_v25 = vadd.f32 %v209_v23, %v175_v14  ;;  %v134_v27 = vpop.f32.mrb[3].mxu0 }
  0xe5   :  { %v160_v26 = vadd.f32 %v215_v24, %v175_v14  ;;  %v154_v28 = vpop.f32.mrb[3].mxu1  ;;  %v135_v29 = vadd.f32 %v175_v14, %v134_v27 }
  0xe6   :  { %v155_v30 = vadd.f32 %v175_v14, %v154_v28  ;;  %166 = vst [vmem:[%s322_s3 + $0x18] sm:$0xff] %v140_v25 }
  0xe7   :  { %170 = vst [vmem:[%s322_s3 + $0x38] sm:$0xff] %v160_v26  ;;  %165 = vst [vmem:[%s322_s3 + $0x10] sm:$0xff] %v135_v29 }
  0xe8   :  { %169 = vst [vmem:[%s322_s3 + $0x30] sm:$0xff] %v155_v30 }

</bundles_post_ra>
